<compile_context>
chip_gen: v7x
topology: tpu7x:2x2x1
jax: 0.10.0
libtpu: 0.0.40
codegen_flags: <defaults>
</compile_context>

<pallas_src>
import jax
import jax.numpy as jnp
from jax.experimental import pallas as pl
from jax.experimental.pallas import tpu as pltpu

EPS = 1e-5  # PyTorch nn.LayerNorm default eps


def _round_up(n, m):
    return (n + m - 1) // m * m


def _layernorm_f32(x, gamma, beta):
    # x, gamma, beta already f32.  Biased variance + eps inside rsqrt, like torch.
    mu = jnp.mean(x, axis=-1, keepdims=True)
    xc = x - mu
    var = jnp.mean(xc * xc, axis=-1, keepdims=True)
    return xc * jax.lax.rsqrt(var + EPS) * gamma + beta


def prenorm_kernel(x_ref, g1_ref, b1_ref, w_ref, bw_ref, g2_ref, b2_ref, o_ref):
    # --- inner LayerNorm (self.norm): stats/normalization in f32 (v5e has no
    #     bf16 VPU/EUP path; f32 also preserves accuracy). Params are pre-cast
    #     to f32 in the wrapper so no per-grid-step casts happen here. ---
    xn = _layernorm_f32(x_ref[...].astype(jnp.float32), g1_ref[...], b1_ref[...])

    # --- fn = nn.Linear(dim, dim):  y = xn @ W^T + b.
    #     W is passed pre-transposed and stays in its storage dtype (input
    #     dtype, e.g. bf16) for the MXU; accumulation is f32. ---
    y = jnp.dot(xn.astype(w_ref.dtype), w_ref[...],
                preferred_element_type=jnp.float32) + bw_ref[...]

    # --- outer LayerNorm (self.norm_out, sandwich=True) ---
    o_ref[...] = _layernorm_f32(y, g2_ref[...], b2_ref[...]).astype(o_ref.dtype)


def prenorm_forward(x, params, *, block_rows=1024, vmem_budget_bytes=24 << 20):
    """x: [B, N, D] -> [B, N, D]."""
    B, N, D = x.shape
    rows = B * N
    x2 = x.reshape(rows, D)

    # Parameters: hoist all f32 casts out of the kernel (they would otherwise
    # re-execute on the VPU every grid step).  W is kept pre-transposed in the
    # params dict (no per-call XLA transpose) and stays in its storage dtype.
    wT = params["wT"]
    f32 = jnp.float32
    g1 = params["g1"].astype(f32).reshape(1, D)
    b1 = params["b1"].astype(f32).reshape(1, D)
    bw = params["bw"].astype(f32).reshape(1, D)
    g2 = params["g2"].astype(f32).reshape(1, D)
    b2 = params["b2"].astype(f32).reshape(1, D)

    act_bytes = jnp.dtype(x.dtype).itemsize
    w_bytes = jnp.dtype(wT.dtype).itemsize

    # --- pick the row tile TM: largest multiple of 8 whose double-buffered
    #     in/out tiles plus the resident weight fit the VMEM budget.  The
    #     24 MiB default budget stays safely inside v7x's 64 MiB VMEM (and its
    #     32 MiB default scoped limit) while still giving 512+ row tiles at
    #     D ~ 1024, which is at the flat part of the HBM-roofline curve. ---
    fixed = 2 * D * D * w_bytes + 2 * 5 * D * 4          # weight + params (dbl-buffered)
    per_row = 2 * D * (act_bytes + act_bytes)            # in + out tiles, double-buffered
    avail = max(vmem_budget_bytes - fixed, per_row * 8)
    tm = avail // per_row
    tm = min(tm, block_rows, _round_up(rows, 8))
    tm = max(8, (tm // 8) * 8)

    # Pad rows so the grid tiles evenly (zero rows are numerically safe and
    # sliced off afterwards).
    rows_p = _round_up(rows, tm)
    if rows_p != rows:
        x2 = jnp.pad(x2, ((0, rows_p - rows), (0, 0)))
    grid = (rows_p // tm,)

    vmem_limit = int(min(max(fixed + tm * per_row + (4 << 20), 32 << 20), 64 << 20))

    cost = pl.CostEstimate(
        flops=2 * rows_p * D * D,
        transcendentals=2 * rows_p,                       # two rsqrt per row
        bytes_accessed=rows_p * D * act_bytes * 2 + D * D * w_bytes + 5 * D * 4,
    )

    # TODO(synk): for real model dims, pad/choose D as a multiple of 128 at the
    # model level (with masked LayerNorm stats) for lane-dense vregs/MXU use.
    out = pl.pallas_call(
        prenorm_kernel,
        out_shape=jax.ShapeDtypeStruct((rows_p, D), x.dtype),
        grid=grid,
        in_specs=[
            pl.BlockSpec((tm, D), lambda i: (i, 0)),   # x row tile (pipelined)
            pl.BlockSpec((1, D), lambda i: (0, 0)),    # gamma_in   (resident)
            pl.BlockSpec((1, D), lambda i: (0, 0)),    # beta_in    (resident)
            pl.BlockSpec((D, D), lambda i: (0, 0)),    # W^T        (resident)
            pl.BlockSpec((1, D), lambda i: (0, 0)),    # linear bias(resident)
            pl.BlockSpec((1, D), lambda i: (0, 0)),    # gamma_out  (resident)
            pl.BlockSpec((1, D), lambda i: (0, 0)),    # beta_out   (resident)
        ],
        out_specs=pl.BlockSpec((tm, D), lambda i: (i, 0)),
        compiler_params=pltpu.CompilerParams(
            dimension_semantics=("parallel",),   # independent row tiles -> 2 TCs on v7x
            vmem_limit_bytes=vmem_limit,
        ),
        cost_estimate=cost,
    )(x2, g1, b1, wT, bw, g2, b2)

    if rows_p != rows:
        out = out[:rows]
    return out.reshape(B, N, D)


def init_params(key, dim, dtype=jnp.float32):
    kw, kb = jax.random.split(key)
    bound = 1.0 / jnp.sqrt(dim)
    w = jax.random.uniform(kw, (dim, dim), jnp.float32, -bound, bound)
    return {
        # nn.LayerNorm(dim): weight=1, bias=0
        "g1": jnp.ones((dim,), jnp.float32),
        "b1": jnp.zeros((dim,), jnp.float32),
        # fn = nn.Linear(dim, dim): store W^T once at init (no per-call transpose)
        "wT": w.T.astype(dtype),
        "bw": jax.random.uniform(kb, (dim,), jnp.float32, -bound, bound),
        # sandwich norm_out = nn.LayerNorm(dim)
        "g2": jnp.ones((dim,), jnp.float32),
        "b2": jnp.zeros((dim,), jnp.float32),
    }


def reference_forward(x, params):
    xf = x.astype(jnp.float32)
    xn = _layernorm_f32(xf, params["g1"], params["b1"])
    y = xn @ params["wT"].astype(jnp.float32) + params["bw"]
    return _layernorm_f32(y, params["g2"], params["b2"]).astype(x.dtype)


if __name__ == "__main__":
    key = jax.random.PRNGKey(0)
    kx, kp = jax.random.split(key)

    B, N, D = 2, 8, 32
    x = jax.random.normal(kx, (B, N, D), jnp.float32)
    params = init_params(kp, D)

    # block_rows=8 forces a multi-step row grid even at this toy size so the
    # tiled/pipelined path is actually exercised.
    out = prenorm_forward(x, params, block_rows=8)
    out = jax.block_until_ready(out)

    ref = reference_forward(x, params)
    assert out.shape == (B, N, D)
    assert jnp.allclose(out, ref, atol=1e-5, rtol=1e-5), "mismatch vs reference"

    print("KERNEL_OK")
</pallas_src>

<mosaic_0001>
module attributes {stable_mosaic.version = 11 : i64} {
  func.func @prenorm_kernel(%arg0: i32, %arg1: memref<8x32xf32, #tpu.memory_space<vmem>>, %arg2: memref<1x32xf32, #tpu.memory_space<vmem>>, %arg3: memref<1x32xf32, #tpu.memory_space<vmem>>, %arg4: memref<32x32xf32, #tpu.memory_space<vmem>>, %arg5: memref<1x32xf32, #tpu.memory_space<vmem>>, %arg6: memref<1x32xf32, #tpu.memory_space<vmem>>, %arg7: memref<1x32xf32, #tpu.memory_space<vmem>>, %arg8: memref<8x32xf32, #tpu.memory_space<vmem>>) attributes {dimension_semantics = [#tpu.dimension_semantics<parallel>], iteration_bounds = array<i64: 2>, scalar_prefetch = 0 : i64, scratch_operands = 0 : i64, tpu.core_type = #tpu.core_type<tc>, window_params = [{transform_indices = @transform_0, window_bounds = array<i64: 8, 32>}, {pipeline_mode = #tpu.pipeline_mode<synchronous>, transform_indices = @transform_1, window_bounds = array<i64: 1, 32>}, {pipeline_mode = #tpu.pipeline_mode<synchronous>, transform_indices = @transform_2, window_bounds = array<i64: 1, 32>}, {pipeline_mode = #tpu.pipeline_mode<synchronous>, transform_indices = @transform_3, window_bounds = array<i64: 32, 32>}, {pipeline_mode = #tpu.pipeline_mode<synchronous>, transform_indices = @transform_4, window_bounds = array<i64: 1, 32>}, {pipeline_mode = #tpu.pipeline_mode<synchronous>, transform_indices = @transform_5, window_bounds = array<i64: 1, 32>}, {pipeline_mode = #tpu.pipeline_mode<synchronous>, transform_indices = @transform_6, window_bounds = array<i64: 1, 32>}, {transform_indices = @transform_7, window_bounds = array<i64: 8, 32>}]} {
    %c0 = arith.constant 0 : index
    %c0_0 = arith.constant 0 : index
    %0 = vector.load %arg1[%c0, %c0_0] : memref<8x32xf32, #tpu.memory_space<vmem>>, vector<8x32xf32>
    %c0_1 = arith.constant 0 : index
    %c0_2 = arith.constant 0 : index
    %1 = vector.load %arg2[%c0_1, %c0_2] : memref<1x32xf32, #tpu.memory_space<vmem>>, vector<1x32xf32>
    %c0_3 = arith.constant 0 : index
    %c0_4 = arith.constant 0 : index
    %2 = vector.load %arg3[%c0_3, %c0_4] : memref<1x32xf32, #tpu.memory_space<vmem>>, vector<1x32xf32>
    %cst = arith.constant dense<0.000000e+00> : vector<8xf32>
    %3 = vector.multi_reduction <add>, %0, %cst [1] : vector<8x32xf32> to vector<8xf32>
    %4 = vector.shape_cast %3 : vector<8xf32> to vector<8x1xf32>
    %cst_5 = arith.constant 3.200000e+01 : f32
    %5 = vector.broadcast %cst_5 : f32 to vector<8x1xf32>
    %6 = arith.divf %4, %5 : vector<8x1xf32>
    %7 = vector.broadcast %6 : vector<8x1xf32> to vector<8x32xf32>
    %8 = arith.subf %0, %7 : vector<8x32xf32>
    %9 = arith.mulf %8, %8 : vector<8x32xf32>
    %cst_6 = arith.constant dense<0.000000e+00> : vector<8xf32>
    %10 = vector.multi_reduction <add>, %9, %cst_6 [1] : vector<8x32xf32> to vector<8xf32>
    %11 = vector.shape_cast %10 : vector<8xf32> to vector<8x1xf32>
    %cst_7 = arith.constant 3.200000e+01 : f32
    %12 = vector.broadcast %cst_7 : f32 to vector<8x1xf32>
    %13 = arith.divf %11, %12 : vector<8x1xf32>
    %cst_8 = arith.constant 9.99999974E-6 : f32
    %14 = vector.broadcast %cst_8 : f32 to vector<8x1xf32>
    %15 = arith.addf %13, %14 : vector<8x1xf32>
    %16 = math.rsqrt %15 : vector<8x1xf32>
    %17 = vector.broadcast %16 : vector<8x1xf32> to vector<8x32xf32>
    %18 = arith.mulf %8, %17 : vector<8x32xf32>
    %19 = vector.broadcast %1 : vector<1x32xf32> to vector<8x32xf32>
    %20 = arith.mulf %18, %19 : vector<8x32xf32>
    %21 = vector.broadcast %2 : vector<1x32xf32> to vector<8x32xf32>
    %22 = arith.addf %20, %21 : vector<8x32xf32>
    %c0_9 = arith.constant 0 : index
    %c0_10 = arith.constant 0 : index
    %23 = vector.load %arg4[%c0_9, %c0_10] : memref<32x32xf32, #tpu.memory_space<vmem>>, vector<32x32xf32>
    %cst_11 = arith.constant dense<0.000000e+00> : vector<8x32xf32>
    %24 = tpu.matmul %22, %23, %cst_11 {dimension_numbers = #tpu.dot_dimension_numbers<[1], [0], [0], [1], [0, 0, 1, 1], [], []>} : vector<8x32xf32>, vector<32x32xf32>, vector<8x32xf32> -> vector<8x32xf32>
    %c0_12 = arith.constant 0 : index
    %c0_13 = arith.constant 0 : index
    %25 = vector.load %arg5[%c0_12, %c0_13] : memref<1x32xf32, #tpu.memory_space<vmem>>, vector<1x32xf32>
    %26 = vector.broadcast %25 : vector<1x32xf32> to vector<8x32xf32>
    %27 = arith.addf %24, %26 : vector<8x32xf32>
    %c0_14 = arith.constant 0 : index
    %c0_15 = arith.constant 0 : index
    %28 = vector.load %arg6[%c0_14, %c0_15] : memref<1x32xf32, #tpu.memory_space<vmem>>, vector<1x32xf32>
    %c0_16 = arith.constant 0 : index
    %c0_17 = arith.constant 0 : index
    %29 = vector.load %arg7[%c0_16, %c0_17] : memref<1x32xf32, #tpu.memory_space<vmem>>, vector<1x32xf32>
    %cst_18 = arith.constant dense<0.000000e+00> : vector<8xf32>
    %30 = vector.multi_reduction <add>, %27, %cst_18 [1] : vector<8x32xf32> to vector<8xf32>
    %31 = vector.shape_cast %30 : vector<8xf32> to vector<8x1xf32>
    %cst_19 = arith.constant 3.200000e+01 : f32
    %32 = vector.broadcast %cst_19 : f32 to vector<8x1xf32>
    %33 = arith.divf %31, %32 : vector<8x1xf32>
    %34 = vector.broadcast %33 : vector<8x1xf32> to vector<8x32xf32>
    %35 = arith.subf %27, %34 : vector<8x32xf32>
    %36 = arith.mulf %35, %35 : vector<8x32xf32>
    %cst_20 = arith.constant dense<0.000000e+00> : vector<8xf32>
    %37 = vector.multi_reduction <add>, %36, %cst_20 [1] : vector<8x32xf32> to vector<8xf32>
    %38 = vector.shape_cast %37 : vector<8xf32> to vector<8x1xf32>
    %cst_21 = arith.constant 3.200000e+01 : f32
    %39 = vector.broadcast %cst_21 : f32 to vector<8x1xf32>
    %40 = arith.divf %38, %39 : vector<8x1xf32>
    %cst_22 = arith.constant 9.99999974E-6 : f32
    %41 = vector.broadcast %cst_22 : f32 to vector<8x1xf32>
    %42 = arith.addf %40, %41 : vector<8x1xf32>
    %43 = math.rsqrt %42 : vector<8x1xf32>
    %44 = vector.broadcast %43 : vector<8x1xf32> to vector<8x32xf32>
    %45 = arith.mulf %35, %44 : vector<8x32xf32>
    %46 = vector.broadcast %28 : vector<1x32xf32> to vector<8x32xf32>
    %47 = arith.mulf %45, %46 : vector<8x32xf32>
    %48 = vector.broadcast %29 : vector<1x32xf32> to vector<8x32xf32>
    %49 = arith.addf %47, %48 : vector<8x32xf32>
    %c0_23 = arith.constant 0 : index
    %c0_24 = arith.constant 0 : index
    %50 = vector.load %arg8[%c0_23, %c0_24] : memref<8x32xf32, #tpu.memory_space<vmem>>, vector<8x32xf32>
    tpu.vector_store %arg8[%c0_23, %c0_24], %49 {strides = array<i32>} : memref<8x32xf32, #tpu.memory_space<vmem>>, vector<8x32xf32>,
    return
  }
  func.func @transform_0(%arg0: i32) -> (i32, i32) {
    %c0_i32 = arith.constant 0 : i32
    %c0_i32_0 = arith.constant 0 : i32
    return %arg0, %c0_i32 : i32, i32
  }
  func.func @transform_1(%arg0: i32) -> (i32, i32) {
    %c0_i32 = arith.constant 0 : i32
    %c0_i32_0 = arith.constant 0 : i32
    %c0_i32_1 = arith.constant 0 : i32
    return %c0_i32, %c0_i32_0 : i32, i32
  }
  func.func @transform_2(%arg0: i32) -> (i32, i32) {
    %c0_i32 = arith.constant 0 : i32
    %c0_i32_0 = arith.constant 0 : i32
    %c0_i32_1 = arith.constant 0 : i32
    return %c0_i32, %c0_i32_0 : i32, i32
  }
  func.func @transform_3(%arg0: i32) -> (i32, i32) {
    %c0_i32 = arith.constant 0 : i32
    %c0_i32_0 = arith.constant 0 : i32
    %c0_i32_1 = arith.constant 0 : i32
    return %c0_i32, %c0_i32_0 : i32, i32
  }
  func.func @transform_4(%arg0: i32) -> (i32, i32) {
    %c0_i32 = arith.constant 0 : i32
    %c0_i32_0 = arith.constant 0 : i32
    %c0_i32_1 = arith.constant 0 : i32
    return %c0_i32, %c0_i32_0 : i32, i32
  }
  func.func @transform_5(%arg0: i32) -> (i32, i32) {
    %c0_i32 = arith.constant 0 : i32
    %c0_i32_0 = arith.constant 0 : i32
    %c0_i32_1 = arith.constant 0 : i32
    return %c0_i32, %c0_i32_0 : i32, i32
  }
  func.func @transform_6(%arg0: i32) -> (i32, i32) {
    %c0_i32 = arith.constant 0 : i32
    %c0_i32_0 = arith.constant 0 : i32
    %c0_i32_1 = arith.constant 0 : i32
    return %c0_i32, %c0_i32_0 : i32, i32
  }
  func.func @transform_7(%arg0: i32) -> (i32, i32) {
    %c0_i32 = arith.constant 0 : i32
    %c0_i32_0 = arith.constant 0 : i32
    return %arg0, %c0_i32 : i32, i32
  }
}

</mosaic_0001>

<bundles_post_ra>
// kernel: tpu_custom_call.1
= control target key start
LH: loop header
LB: loop body
LE: loop exit
PB: predicated region body
PF: predicated region fallthrough
CT: control target
= control target key end

     0   :  { %12 = vsyncpa [#allocation3], 0  ;;  %s1056_s0 = inlined_call_operand.hbm [shape: f32[16,32], index: 0, kind: input, shape index: {}]   ;;  %s1057_s1 = inlined_call_operand.vmem [shape: f32[1,32], index: 1, kind: input, shape index: {}]   ;;  %s1058_s2 = inlined_call_operand.vmem [shape: f32[1,32], index: 2, kind: input, shape index: {}]   ;;  %s1059_s3 = inlined_call_operand.hbm [shape: f32[32,32], index: 3, kind: input, shape index: {}]   ;;  %s1060_s4 = inlined_call_operand.vmem [shape: f32[1,32], index: 4, kind: input, shape index: {}]   ;;  %s1061_s5 = inlined_call_operand.vmem [shape: f32[1,32], index: 5, kind: input, shape index: {}]   ;;  %s1062_s6 = inlined_call_operand.vmem [shape: f32[1,32], index: 6, kind: input, shape index: {}]   ;;  %s1063_s7 = inlined_call_operand.hbm [shape: f32[16,32], index: 7, kind: output, shape index: {}]  }
   0x1   :  { %14 = vsyncpa [#allocation3 + $0x1], 0 }
   0x2   :  { %15 = vsyncpa [#allocation6], 0 }
   0x3   :  { %16 = vsyncpa [#allocation4], 0 }
   0x4   :  { %18 = vsyncpa [#allocation4 + $0x1], 0  ;;  %s835_s24 = smov 0   ;;  %s837_s25 = smov 0  }
   0x5   :  { %s839_s26 = smov 0   ;;  %s841_s27 = smov 0  }
   0x6 LB: > { %s856_s28 = sadd.s32 4294967295, %s785_s27   ;;  %s549_s29 = sadd.s32 4294967294, %s785_s27   ;;  %s785_s27 = sphi %s841_s27, %s1083_s27   ;;  %s781_s26 = sphi %s839_s26, %s1082_s26   ;;  %s777_s25 = sphi %s837_s25, %s1081_s25   ;;  %s773_s24 = sphi %s835_s24, %s1080_s24  }
   0x7   : > { %p44_p0 = scmp.ne.s32.totalorder %s777_s25, %s773_s24  ;;  %p1064_p1 = scmp.eq.s32.totalorder %s856_s28, 0 }
   0x8   : > { %p200_p3 = scmp.eq.s32.totalorder %s549_s29, 1  ;;  %p550_p5 = scmp.ge.s32.totalorder %s785_s27, 1 }
   0x9   : > { %p865_p4 = por %p1064_p1, %p44_p0  ;;  %p207_p7 = scmp.lt.s32.totalorder %s785_s27, 3 }
   0xa   : > { %p870_p6 = por %p200_p3, %p44_p0  ;;  %s787_s10 = smov [#allocation5]  }
   0xb   : > { %s1067_s30 = scalar_select %p865_p4, 1, 0 }
   0xc   : > { %s1068_s8 = scalar_select %p870_p6, 1, 0 }
   0xd   : > { %p875_p8 = pnand %p550_p5, %p207_p7  ;;  %s225_s11 = sshll.u32 %s787_s10, 4  ;;  %s879_s11 = int_to_ptr.vmem [resolvable:$true] %s225_s11 }
   0xe   : > { %s891_s13 = sadd.s32 1, %s785_s27   ;;  %s31_s14 = sadd.s32 1, %s781_s26 }
   0xf   : > { %s1069_s9 = scalar_select %p875_p8, 1, 0 }
  0x10   : > { %p599_p9 = pneg %p875_p8  ;;  %s28_s15 = ssub.s32 %s785_s27, %s891_s13 }
  0x11   : > { %s657_s18 = scalar_lea.hbm %s1059_s3, 512 }
  0x12   : > { %p886_p11 = pnand %p599_p9, %p1064_p1  ;;  %p658_p12 = scmp.ne.s32.totalorder %s1059_s3, %s657_s18 }
  0x13   : > { %p664_p5 = scmp.lt.u32.totalorder %s657_s18, %s1059_s3 }
  0x14   : > { %p659_p13 = pneg %p886_p11 }
  0x16   : > { %p660_p0 = pnand %p659_p13, %p658_p12 }
  0x18   : > { %p661_p3 = pneg %p660_p0 }
  0x1a   : > { %p666_p7 = pnand %p664_p5, %p661_p3 }
  0x1c   : > { %669 = shalt.err (!%p666_p7)
}
  0x1d   : > { %s670_s23 = scalar_lea.vmem %s879_s11, 512  ;;  %p678_p2 = scmp.lt.s32.totalorder %s879_s11, %s879_s11 }
  0x1e   : > { %p671_p9 = scmp.ne.s32.totalorder %s879_s11, %s670_s23  ;;  %p679_p6 = scmp.lt.s32.totalorder %s670_s23, %s670_s23 }
  0x20   : > { %p673_p10 = pnand %p671_p9, %p659_p13  ;;  %p680_p4 = por %p679_p6, %p678_p2 }
  0x22   : > { %p674_p1 = pneg %p673_p10 }
  0x24   : > { %p681_p8 = pnand %p680_p4, %p674_p1 }
  0x26   : > { %684 = shalt.err (!%p681_p8)
}
  0x27   : > { %s788_s29 = smov 128   ;;  %s789_s10 = smov 8  }
  0x28   : > { %602 = dma.hbm_to_vmem [thread:$0]  (!%p886_p11), %s1059_s3, 512, %s879_s11, [#allocation6], %s788_s29, %s788_s29, %s789_s10  }
  0x29   : > { %p29_p2 = scmp.eq.s32.totalorder %s28_s15, 0  ;;  %p38_p1 = scmp.ne.s32.totalorder %s781_s26, %s777_s25 }
  0x2a   : > { %p39_p4 = scmp.eq.s32.totalorder %s785_s27, 0  ;;  %p612_p6 = scmp.lt.s32.totalorder %s785_s27, 2 }
  0x2b   : > { %s922_s18 = scalar_select %p29_p2, %s781_s26, %s31_s14  }
  0x2c   : > { %p40_p8 = por %p39_p4, %p38_p1  ;;  %p1071_p10 = scmp.eq.s32.totalorder %s856_s28, 1 }
  0x2d   : > { %s248_s20 = sand.u32 1, %s781_s26   ;;  %s554_s21 = sshll.u32 %s785_s27, 7 }
  0x2e   : > { %p926_p12 = por %p1071_p10, %p38_p1  ;;  %s553_s22 = sshll.u32 %s248_s20, 3 }
  0x2f   : > { %s935_s16 = scalar_lea.hbm %s1056_s0, %s554_s21  ;;  %s252_s11 = scalar_lea.vmem [#allocation2], %s553_s22 }
  0x30   : > { %s259_s14 = sshll.u32 %s252_s11, 4  ;;  %p937_p11 = pnand %p612_p6, %p40_p8  ;;  %s941_s14 = int_to_ptr.vmem [resolvable:$true] %s259_s14 }
  0x31   : > { %s249_s29 = scalar_lea.sflag [#allocation3], %s248_s20  ;;  %s685_s10 = scalar_lea.hbm %s935_s16, 128 }
  0x32   : > { %p686_p13 = scmp.ne.s32.totalorder %s935_s16, %s685_s10  ;;  %p687_p0 = pneg %p937_p11 }
  0x33   : > { %s690_s22 = scalar_lea.hbm %s1056_s0, 256  ;;  %p691_p7 = scmp.lt.u32.totalorder %s935_s16, %s1056_s0 }
  0x34   : > { %p688_p3 = pnand %p687_p0, %p686_p13  ;;  %p692_p9 = scmp.lt.u32.totalorder %s690_s22, %s685_s10 }
  0x35   : > { %p694_p1 = scmp.lt.u32.totalorder %s685_s10, %s935_s16 }
  0x36   : > { %p689_p5 = pneg %p688_p3  ;;  %p693_p2 = por %p692_p9, %p691_p7 }
  0x38   : > { %p695_p4 = por %p694_p1, %p693_p2 }
  0x3a   : > { %p696_p6 = pnand %p695_p4, %p689_p5 }
  0x3c   : > { %699 = shalt.err (!%p696_p6)
}
  0x3d   : > { %s700_s20 = scalar_lea.vmem %s941_s14, 128  ;;  %s790_s11 = smov [#allocation2]  }
  0x3e   : > { %p701_p8 = scmp.ne.s32.totalorder %s941_s14, %s700_s20  ;;  %s705_s17 = sshll.u32 %s790_s11, 4  ;;  %s706_s17 = int_to_ptr.vmem [resolvable:$false] %s705_s17 }
  0x3f   : > { %s707_s21 = scalar_lea.vmem %s706_s17, 256  ;;  %p708_p3 = scmp.lt.s32.totalorder %s941_s14, %s706_s17 }
  0x40   : > { %p703_p10 = pnand %p701_p8, %p687_p0  ;;  %p709_p7 = scmp.lt.s32.totalorder %s707_s21, %s700_s20 }
  0x42   : > { %p704_p13 = pneg %p703_p10  ;;  %p710_p9 = por %p709_p7, %p708_p3 }
  0x44   : > { %p711_p2 = pnand %p710_p9, %p704_p13 }
  0x46   : > { %714 = shalt.err (!%p711_p2)
}
  0x47   : > { %606 = dma.hbm_to_vmem [thread:$0]  (!%p937_p11), %s935_s16, 128, %s941_s14, %s249_s29  }
  0x48   : > { %p1074_p5 = scmp.ne.s32.totalorder %s1069_s9, 0 }
  0x49   : > { %s971_s10 = sand.u32 (!%p1074_p5), 1, %s777_s25   ;;  %p1075_p0 = scmp.ne.s32.totalorder (!%p1074_p5), %s1067_s30, 0 }
  0x4a   : > { %268 = sbr.rel (%p1074_p5) target bundleno = 940 (0x3ac), region = 48  ;;  %s556_s22 = sshll.u32 (!%p1074_p5), %s971_s10, 3 }
  0x4b   : > { %s271_s12 = scalar_lea.sflag (!%p1074_p5), [#allocation3], %s971_s10  ;;  %s274_s23 = scalar_lea.vmem (!%p1074_p5), [#allocation2], %s556_s22 }
  0x51   : > { %760 = dma.done.wait (%p1075_p0), %s271_s12, 128  }
  0x52   : > { %762 = vsyncadd (%p1075_p0), %s271_s12, 4294967168  ;;  %p1076_p11 = scmp.eq.s32.totalorder %s856_s28, 0 }
  0x54   : > { %764 = dma.done.wait (%p1076_p11), [#allocation6], 512   ;;  %p1077_p1 = pmov %p1076_p11 }
  0x55   : > { %vm312_vm0 = vcmask 261120   ;;  %v309_v0 = vld [vmem:[%s274_s23] sm:$0xff]  ;;  %v341_v7 = vld [vmem:[#allocation5] sm:$0xff]  ;;  %v342_v8 = vld [vmem:[#allocation5 + $0x8] sm:$0xff]  ;;  %v791_v10 = vmov 0.0|0.0   ;;  %vm792_vm1 = vmmov 0  }
  0x56   : > { %766 = vsyncadd (%p1077_p1), [#allocation6], 4294966784  ;;  %v313_v1 = vsel %vm312_vm0, %v309_v0, 0.0  ;;  %v343_v9 = vld [vmem:[#allocation5 + $0x10] sm:$0xff]  ;;  %585 = vmatprep.subr.bf16.mxu0 %v791_v10  ;;  %v586_v11 = vpack.c.bf16 %v342_v8, %v341_v7  ;;  %v344_v12 = vld [vmem:[#allocation5 + $0x18] sm:$0xff]  ;;  %v793_v13 = vmov 0.0  }
  0x57   : > { %314 = vadd.xlane.f32.xlu0 %v313_v1  ;;  %582 = vmatprep.mubr.msk.f32.mxu0 %vm792_vm1, %v793_v13  ;;  %v589_v14 = vpack.c.bf16 %v344_v12, %v343_v9  ;;  %v559_v19 = vld [vmem:[%s1057_s1] ss:$0 sm:$0xff]  ;;  %s566_s12 = sshll.u32 %s856_s28, 7  ;;  %s308_s23 = scalar_lea.vmem [#allocation7], %s556_s22 }
  0x58   : > { %587 = vmatpush3.bf16.msra.mxu0 %v586_v11  ;;  %v560_v21 = vld [vmem:[%s1058_s2] ss:$0 sm:$0xff]  ;;  %s469_s30 = sshll.u32 %s308_s23, 4  ;;  %s1011_s14 = scalar_lea.hbm %s1063_s7, %s566_s12  ;;  %s1013_s30 = int_to_ptr.vmem [resolvable:$true] %s469_s30 }
  0x59   : > { %588 = vmatprep.subr.bf16.mxu0 %v791_v10  ;;  %v561_v24 = vld [vmem:[%s1060_s4] ss:$0 sm:$0xff]  ;;  %s456_s15 = scalar_lea.sflag [#allocation4], %s971_s10  ;;  %s715_s29 = scalar_lea.vmem %s1013_s30, 128 }
  0x5a   : > { %v563_v38 = vld [vmem:[%s1061_s5] ss:$0 sm:$0xff]  ;;  %p716_p4 = scmp.ne.s32.totalorder %s1013_s30, %s715_s29  ;;  %s794_s28 = smov [#allocation7]  }
  0x5b   : > { %v564_v40 = vld [vmem:[%s1062_s6] ss:$0 sm:$0xff]  ;;  %s719_s22 = sshll.u32 %s794_s28, 4  ;;  %s720_s22 = int_to_ptr.vmem [resolvable:$false] %s719_s22 }
  0x5c   : > { %590 = vmatpush3.bf16.msra.mxu0 %v589_v14  ;;  %p717_p6 = pnand %p716_p4, %p926_p12  ;;  %s721_s20 = scalar_lea.vmem %s720_s22, 256 }
  0x5d   : > { %p722_p10 = scmp.lt.s32.totalorder %s1013_s30, %s720_s22  ;;  %p723_p13 = scmp.lt.s32.totalorder %s721_s20, %s715_s29 }
  0x5e   : > { %p718_p8 = pneg %p717_p6 }
  0x5f   : > { %p724_p3 = por %p723_p13, %p722_p10 }
  0x61   : > { %p725_p7 = pnand %p724_p3, %p718_p8 }
  0xe4   : > { %v315_v2 = vpop.xlane.xlu0 %314 }
  0xe5   : > { %v317_v3 = vmul.f32 0.03125, %v315_v2 }
  0xe7   : > { %v318_v4 = vsub.f32 %v309_v0, %v317_v3 }
  0xe9   : > { %v319_v5 = vmul.f32 %v318_v4, %v318_v4 }
  0xeb   : > { %v320_v6 = vsel %vm312_vm0, %v319_v5, 0.0 }
  0xec   : > { %321 = vadd.xlane.f32.xlu0 %v320_v6 }
 0x179   : > { %v322_v15 = vpop.xlane.xlu0 %321 }
 0x17a   : > { %v323_v16 = vmul.f32 0.03125, %v322_v15 }
 0x17c   : > { %v324_v17 = vadd.f32 1e-05, %v323_v16 }
 0x17e   : > { %653 = vrsqrt.f32 %v324_v17 }
 0x188   : > { %v654_v18 = vpop.eup %653 }
 0x189   : > { %v326_v20 = vmul.f32 %v654_v18, %v318_v4 }
 0x18b   : > { %v333_v22 = vmul.f32 %v559_v19, %v326_v20 }
 0x18d   : > { %v340_v23 = vadd.f32 %v560_v21, %v333_v22 }
 0x18f   : > { %583 = vmatmul.mubr.msk.f32.vlgmr.msra.gmra.mrb[0].mxu0 %vm312_vm0, %v340_v23 }
 0x262   : > { %v421_v25 = vpop.f32.mrb[0].mxu0 }
 0x263   : > { %v422_v26 = vadd.f32 %v561_v24, %v421_v25  ;;  %v584_v27 = vpop.f32.mrb[1].mxu0 }
 0x265   : > { %v427_v28 = vsel %vm312_vm0, %v422_v26, 0.0 }
 0x266   : > { %428 = vadd.xlane.f32.xlu1 %v427_v28 }
 0x2f3   : > { %v429_v29 = vpop.xlane.xlu1 %428 }
 0x2f4   : > { %v430_v30 = vmul.f32 0.03125, %v429_v29 }
 0x2f6   : > { %v431_v31 = vsub.f32 %v422_v26, %v430_v30 }
 0x2f8   : > { %v432_v32 = vmul.f32 %v431_v31, %v431_v31 }
 0x2fa   : > { %v433_v33 = vsel %vm312_vm0, %v432_v32, 0.0 }
 0x2fb   : > { %434 = vadd.xlane.f32.xlu1 %v433_v33 }
 0x388   : > { %v435_v34 = vpop.xlane.xlu1 %434 }
 0x389   : > { %v436_v35 = vmul.f32 0.03125, %v435_v34 }
 0x38b   : > { %v437_v36 = vadd.f32 1e-05, %v436_v35 }
 0x38d   : > { %655 = vrsqrt.f32 %v437_v36 }
 0x397   : > { %v656_v37 = vpop.eup %655 }
 0x398   : > { %v439_v39 = vmul.f32 %v656_v37, %v431_v31 }
 0x39a   : > { %v446_v41 = vmul.f32 %v563_v38, %v439_v39 }
 0x39c   : > { %v453_v42 = vadd.f32 %v564_v40, %v446_v41 }
 0x39e   : > { %454 = vst.msk [vmem:[%s308_s23] sm:$0xff] %vm312_vm0, %v453_v42 }
 0x39f   : > { %728 = shalt.err (!%p725_p7)
}
 0x3a0   : > { %s729_s10 = scalar_lea.hbm %s1011_s14, 128  ;;  %s733_s21 = scalar_lea.hbm %s1063_s7, 256 }
 0x3a1   : > { %p730_p9 = scmp.ne.s32.totalorder %s1011_s14, %s729_s10  ;;  %p734_p0 = scmp.lt.u32.totalorder %s1011_s14, %s1063_s7 }
 0x3a2   : > { %p735_p11 = scmp.lt.u32.totalorder %s733_s21, %s729_s10  ;;  %p737_p4 = scmp.lt.u32.totalorder %s729_s10, %s1011_s14 }
 0x3a3   : > { %p731_p2 = pnand %p730_p9, %p926_p12 }
 0x3a4   : > { %p736_p1 = por %p735_p11, %p734_p0 }
 0x3a5   : > { %p732_p5 = pneg %p731_p2 }
 0x3a6   : > { %p738_p6 = por %p737_p4, %p736_p1 }
 0x3a8   : > { %p739_p8 = pnand %p738_p6, %p732_p5 }
 0x3aa   : > { %742 = shalt.err (!%p739_p8)
}
 0x3ab   : > { %597 = dma.vmem_to_hbm [thread:$0]  (%p926_p12), %s1013_s30, 128, %s1011_s14, %s456_s15  }
 0x3ac PF: > { %s481_s9 = sand.u32 1, %s773_s24   ;;  %p1078_p10 = scmp.ne.s32.totalorder %s1068_s8, 0 }
 0x3ad   : > { %p1079_p13 = scmp.ge.s32.totalorder %s785_s27, 2  ;;  %s482_s16 = scalar_lea.sflag [#allocation4], %s481_s9 }
 0x3af   : > { %p608_p3 = pnand %p1079_p13, %p1078_p10 }
 0x3b1   : > { %768 = dma.done.wait (!%p608_p3), %s482_s16, 128  }
 0x3b2   : > { %770 = vsyncadd (!%p608_p3), %s482_s16, 4294967168  ;;  %p21_p7 = scmp.ge.s32.totalorder %s891_s13, 4   ;;  %s1080_s24 = smov %s777_s25 }
 0x3b3   : > { %s1081_s25 = smov %s781_s26  ;;  %s1082_s26 = smov %s922_s18 }
 0x3b4   : > { %s1083_s27 = smov %s891_s13  ;;  %23 = sbr.rel (!%p21_p7) target bundleno = 6 (0x6), region = 97 }
 0x3bb   :  { %487 = vsyncpa [#allocation3], 1 }
 0x3bc   :  { %489 = vsyncpa [#allocation3 + $0x1], 1 }
 0x3bd   :  { %490 = vsyncpa [#allocation6], 1 }
 0x3be   :  { %491 = vsyncpa [#allocation4], 1 }
 0x3bf   :  { %493 = vsyncpa [#allocation4 + $0x1], 1 }

</bundles_post_ra>
